<compile_context>
chip_gen: v7x
topology: tpu7x:2x2x1
jax: 0.10.0
libtpu: 0.0.40
codegen_flags: <defaults>
</compile_context>

<pallas_src>
import functools

import jax
import jax.numpy as jnp
from jax.experimental import pallas as pl
from jax.experimental.pallas import tpu as pltpu

_NEG = -1e30          # filler for padded logit lanes (never wins max/argmax)
_TB_MAX = 512         # batch tile rows (VMEM-safe on v5e/v6e/v7x)


# -------------------------- Pallas kernel ---------------------------------

def policy_act_kernel(x_ref, p_ref, out_ref, *, hidden, num_actions):
    f32 = jnp.float32
    H = hidden
    F = 2 * H                         # fused actor|critic width (= 128)

    x = x_ref[...]                    # (TB, F) obs, feature-padded with zeros

    # packed params: p_ref[l] = [ W_l (F x F) ; bias_l (1 x F) ; zero pad ]
    p0, p1, p2 = p_ref[0], p_ref[1], p_ref[2]
    w1, b1 = p0[0:F, :], p0[F:F + 1, :]
    w2, b2 = p1[0:F, :], p1[F:F + 1, :]
    w3, b3 = p2[0:F, :], p2[F:F + 1, :]

    # fused layer 1: [actor hidden | critic hidden]
    h1 = jnp.tanh(jnp.dot(x, w1, preferred_element_type=f32) + b1)
    # fused (block-diagonal) layer 2: [actor features | critic hidden]
    h2 = jnp.tanh(jnp.dot(h1, w2, preferred_element_type=f32) + b2)
    # fused layer 3: cols [0, A) = logits, col F-1 = critic value, rest pad
    zo = jnp.dot(h2, w3, preferred_element_type=f32) + b3

    col = jax.lax.broadcasted_iota(jnp.int32, zo.shape, 1)
    logits = jnp.where(col < num_actions, zo, jnp.float32(_NEG))

    # stable log-softmax + deterministic action = argmax (first-index ties)
    m = jnp.max(logits, axis=-1, keepdims=True)
    lse = m + jnp.log(jnp.sum(jnp.exp(logits - m), axis=-1, keepdims=True))
    action = jnp.min(jnp.where(logits == m, col, jnp.int32(F)),
                     axis=-1, keepdims=True)
    value = zo[:, F - 1:F]
    logp = m - lse                    # log-prob of the argmax action

    # single lane-dense output slab: [feat(H) | value | logp | action | 0-pad]
    out = jnp.where(col < H, h2, 0.0)
    out = jnp.where(col == H, value, out)
    out = jnp.where(col == H + 1, logp, out)
    out = jnp.where(col == H + 2, action.astype(f32), out)
    out_ref[...] = out


# -------------------------- wrapper ----------------------------------------

@functools.partial(jax.jit, static_argnames=("num_actions", "hidden"))
def policy_act(x, rnn_hxs, masks, packed_params, *, num_actions, hidden=64):
    """Equivalent of Policy.act(inputs, rnn_hxs, masks, deterministic=True)
    for the non-recurrent MLP base + Discrete action space."""
    B, d_in = x.shape
    H = hidden
    F = 2 * H
    assert F == 128, "fused kernel assumes hidden_size == 64 (module default)"

    # batch padding / tiling
    b8 = ((B + 7) // 8) * 8
    tb = min(b8, _TB_MAX)
    nb = -(-b8 // tb)
    bp = nb * tb

    # pad obs to (Bp, F) so layer-1 is a clean 128-wide contraction
    x_pad = jnp.zeros((bp, F), jnp.float32).at[:B, :d_in].set(x.astype(jnp.float32))

    kernel = functools.partial(policy_act_kernel, hidden=H, num_actions=num_actions)
    out = pl.pallas_call(
        kernel,
        out_shape=jax.ShapeDtypeStruct((bp, F), jnp.float32),
        grid=(nb,),
        in_specs=[
            pl.BlockSpec((tb, F), lambda i: (i, 0)),            # obs tile
            pl.BlockSpec((3, F + 8, F), lambda i: (0, 0, 0)),   # resident params
        ],
        out_specs=pl.BlockSpec((tb, F), lambda i: (i, 0)),
        compiler_params=pltpu.CompilerParams(
            dimension_semantics=("parallel",)),
    )(x_pad, packed_params)

    feat = out[:B, 0:H]
    value = out[:B, H:H + 1]
    logp = out[:B, H + 1:H + 2]
    action = out[:B, H + 2:H + 3].astype(jnp.int32)   # exact: small integers

    # non-recurrent base: rnn_hxs passed through untouched (masks unused)
    del masks
    # TODO(synk): recurrent GRU path (_forward_gru) and stochastic sampling
    # (dist.sample) are not implemented in-kernel.
    return value, action, logp, rnn_hxs, feat


# -------------------------- parameter init & packing ------------------------

def _orthogonal(key, out_dim, in_dim, gain):
    """Mimics torch.nn.init.orthogonal_ on a (out, in) weight, returns [in,out]."""
    rows, cols = out_dim, in_dim
    a = jax.random.normal(key, (max(rows, cols), min(rows, cols)), jnp.float32)
    q, r = jnp.linalg.qr(a)
    q = q * jnp.sign(jnp.diag(r))[None, :]
    if rows < cols:
        q = q.T
    w = gain * q[:rows, :cols]            # torch layout [out, in]
    return jnp.asarray(w.T, jnp.float32)  # kernel layout [in, out]


def make_params(key, d_in, hidden, n_actions):
    ks = jax.random.split(key, 6)
    g = jnp.sqrt(2.0)  # nn.init gain used in ActorCriticMLP (np.sqrt(2))
    zeros = lambda n: jnp.zeros((1, n), jnp.float32)
    return {
        # actor
        "wa1": _orthogonal(ks[0], hidden, d_in, g), "ba1": zeros(hidden),
        "wa2": _orthogonal(ks[1], hidden, hidden, g), "ba2": zeros(hidden),
        # critic
        "wc1": _orthogonal(ks[2], hidden, d_in, g), "bc1": zeros(hidden),
        "wc2": _orthogonal(ks[3], hidden, hidden, g), "bc2": zeros(hidden),
        "wc3": _orthogonal(ks[4], 1, hidden, g), "bc3": zeros(1),
        # dist layer (Categorical uses gain=0.01 in the reference repo)
        "wd": _orthogonal(ks[5], n_actions, hidden, 0.01), "bd": zeros(n_actions),
    }


def pack_params(p, d_in, hidden, n_actions):
    """Pack all Policy parameters into one (3, 2H+8, 2H) VMEM slab."""
    H = hidden
    F = 2 * H
    assert F == 128, "fused packing assumes hidden_size == 64"
    assert d_in <= F, "input dim must fit in one 128-lane tile"
    assert n_actions <= F - 1, "action dim must leave the value column free"

    # layer 1: [wa1 | wc1], input rows padded to F
    w1 = jnp.zeros((F, F), jnp.float32)
    w1 = w1.at[:d_in, :H].set(p["wa1"]).at[:d_in, H:].set(p["wc1"])
    b1 = jnp.zeros((1, F), jnp.float32)
    b1 = b1.at[:, :H].set(p["ba1"]).at[:, H:].set(p["bc1"])

    # layer 2: block-diag(wa2, wc2)
    w2 = jnp.zeros((F, F), jnp.float32)
    w2 = w2.at[:H, :H].set(p["wa2"]).at[H:, H:].set(p["wc2"])
    b2 = jnp.concatenate([p["ba2"], p["bc2"]], axis=1)

    # layer 3: dist logits (cols [0, A)) + value head (col F-1)
    w3 = jnp.zeros((F, F), jnp.float32)
    w3 = w3.at[:H, :n_actions].set(p["wd"]).at[H:, F - 1:F].set(p["wc3"])
    b3 = jnp.zeros((1, F), jnp.float32)
    b3 = b3.at[:, :n_actions].set(p["bd"]).at[:, F - 1:F].set(p["bc3"])

    def slab(w, b):
        s = jnp.zeros((F + 8, F), jnp.float32)
        return s.at[:F, :].set(w).at[F:F + 1, :].set(b)

    return jnp.stack([slab(w1, b1), slab(w2, b2), slab(w3, b3)], axis=0)


# -------------------------- reference (pure JAX) ----------------------------

def policy_act_ref(x, params):
    lin = lambda h, w, b: h @ w + b
    feat = jnp.tanh(lin(jnp.tanh(lin(x, params["wa1"], params["ba1"])),
                        params["wa2"], params["ba2"]))
    hc = jnp.tanh(lin(jnp.tanh(lin(x, params["wc1"], params["bc1"])),
                      params["wc2"], params["bc2"]))
    value = lin(hc, params["wc3"], params["bc3"])
    logits = lin(feat, params["wd"], params["bd"])
    action = jnp.argmax(logits, axis=-1, keepdims=True).astype(jnp.int32)
    logp = jnp.max(jax.nn.log_softmax(logits, axis=-1), axis=-1, keepdims=True)
    return value, action, logp, feat


# -------------------------- main --------------------------------------------

if __name__ == "__main__":
    B, D_IN, HIDDEN, N_ACTIONS = 8, 16, 64, 6

    key = jax.random.PRNGKey(0)
    k_x, k_p = jax.random.split(key)
    x = jax.random.normal(k_x, (B, D_IN), jnp.float32)
    rnn_hxs = jnp.zeros((B, 1), jnp.float32)   # recurrent_hidden_state_size == 1
    masks = jnp.ones((B, 1), jnp.float32)

    raw_params = make_params(k_p, D_IN, HIDDEN, N_ACTIONS)
    packed = pack_params(raw_params, D_IN, HIDDEN, N_ACTIONS)

    value, action, logp, rnn_hxs_out, feat = policy_act(
        x, rnn_hxs, masks, packed, num_actions=N_ACTIONS, hidden=HIDDEN)
    jax.block_until_ready((value, action, logp, rnn_hxs_out, feat))

    v_ref, a_ref, lp_ref, f_ref = policy_act_ref(x, raw_params)
    assert value.shape == (B, 1) and action.shape == (B, 1) and logp.shape == (B, 1)
    assert jnp.allclose(value, v_ref, rtol=1e-2, atol=1e-2)
    assert jnp.allclose(feat, f_ref, rtol=1e-2, atol=1e-2)
    assert jnp.allclose(logp, lp_ref, rtol=1e-2, atol=1e-2)
    assert jnp.array_equal(action[:, 0], a_ref[:, 0])

    print("KERNEL_OK")
</pallas_src>

<mosaic_0001>
module attributes {stable_mosaic.version = 11 : i64} {
  func.func @policy_act_kernel(%arg0: i32, %arg1: memref<8x128xf32, #tpu.memory_space<vmem>>, %arg2: memref<3x136x128xf32, #tpu.memory_space<vmem>>, %arg3: memref<8x128xf32, #tpu.memory_space<vmem>>) attributes {dimension_semantics = [#tpu.dimension_semantics<parallel>], iteration_bounds = array<i64: 1>, scalar_prefetch = 0 : i64, scratch_operands = 0 : i64, tpu.core_type = #tpu.core_type<tc>, window_params = [{transform_indices = @transform_0, window_bounds = array<i64: 8, 128>}, {pipeline_mode = #tpu.pipeline_mode<synchronous>, transform_indices = @transform_1, window_bounds = array<i64: 3, 136, 128>}, {transform_indices = @transform_2, window_bounds = array<i64: 8, 128>}]} {
    %c0 = arith.constant 0 : index
    %c0_0 = arith.constant 0 : index
    %0 = vector.load %arg1[%c0, %c0_0] : memref<8x128xf32, #tpu.memory_space<vmem>>, vector<8x128xf32>
    %c0_1 = arith.constant 0 : index
    %c0_2 = arith.constant 0 : index
    %c0_3 = arith.constant 0 : index
    %1 = vector.load %arg2[%c0_1, %c0_2, %c0_3] : memref<3x136x128xf32, #tpu.memory_space<vmem>>, vector<1x136x128xf32>
    %2 = vector.shape_cast %1 : vector<1x136x128xf32> to vector<136x128xf32>
    %c1 = arith.constant 1 : index
    %c0_4 = arith.constant 0 : index
    %c0_5 = arith.constant 0 : index
    %3 = vector.load %arg2[%c1, %c0_4, %c0_5] : memref<3x136x128xf32, #tpu.memory_space<vmem>>, vector<1x136x128xf32>
    %4 = vector.shape_cast %3 : vector<1x136x128xf32> to vector<136x128xf32>
    %c2 = arith.constant 2 : index
    %c0_6 = arith.constant 0 : index
    %c0_7 = arith.constant 0 : index
    %5 = vector.load %arg2[%c2, %c0_6, %c0_7] : memref<3x136x128xf32, #tpu.memory_space<vmem>>, vector<1x136x128xf32>
    %6 = vector.shape_cast %5 : vector<1x136x128xf32> to vector<136x128xf32>
    %7 = vector.extract_strided_slice %2 {offsets = [0, 0], sizes = [128, 128], strides = [1, 1]} : vector<136x128xf32> to vector<128x128xf32>
    %8 = vector.extract_strided_slice %2 {offsets = [128, 0], sizes = [1, 128], strides = [1, 1]} : vector<136x128xf32> to vector<1x128xf32>
    %9 = vector.extract_strided_slice %4 {offsets = [0, 0], sizes = [128, 128], strides = [1, 1]} : vector<136x128xf32> to vector<128x128xf32>
    %10 = vector.extract_strided_slice %4 {offsets = [128, 0], sizes = [1, 128], strides = [1, 1]} : vector<136x128xf32> to vector<1x128xf32>
    %11 = vector.extract_strided_slice %6 {offsets = [0, 0], sizes = [128, 128], strides = [1, 1]} : vector<136x128xf32> to vector<128x128xf32>
    %12 = vector.extract_strided_slice %6 {offsets = [128, 0], sizes = [1, 128], strides = [1, 1]} : vector<136x128xf32> to vector<1x128xf32>
    %cst = arith.constant dense<0.000000e+00> : vector<8x128xf32>
    %13 = tpu.matmul %0, %7, %cst {dimension_numbers = #tpu.dot_dimension_numbers<[1], [0], [0], [1], [0, 0, 1, 1], [], []>} : vector<8x128xf32>, vector<128x128xf32>, vector<8x128xf32> -> vector<8x128xf32>
    %14 = vector.broadcast %8 : vector<1x128xf32> to vector<8x128xf32>
    %15 = arith.addf %13, %14 : vector<8x128xf32>
    %16 = math.tanh %15 : vector<8x128xf32>
    %cst_8 = arith.constant dense<0.000000e+00> : vector<8x128xf32>
    %17 = tpu.matmul %16, %9, %cst_8 {dimension_numbers = #tpu.dot_dimension_numbers<[1], [0], [0], [1], [0, 0, 1, 1], [], []>} : vector<8x128xf32>, vector<128x128xf32>, vector<8x128xf32> -> vector<8x128xf32>
    %18 = vector.broadcast %10 : vector<1x128xf32> to vector<8x128xf32>
    %19 = arith.addf %17, %18 : vector<8x128xf32>
    %20 = math.tanh %19 : vector<8x128xf32>
    %cst_9 = arith.constant dense<0.000000e+00> : vector<8x128xf32>
    %21 = tpu.matmul %20, %11, %cst_9 {dimension_numbers = #tpu.dot_dimension_numbers<[1], [0], [0], [1], [0, 0, 1, 1], [], []>} : vector<8x128xf32>, vector<128x128xf32>, vector<8x128xf32> -> vector<8x128xf32>
    %22 = vector.broadcast %12 : vector<1x128xf32> to vector<8x128xf32>
    %23 = arith.addf %21, %22 : vector<8x128xf32>
    %24 = tpu.iota {dimensions = array<i32: 1>} : vector<8x128xi32>
    %c6_i32 = arith.constant 6 : i32
    %25 = vector.broadcast %c6_i32 : i32 to vector<8x128xi32>
    %26 = arith.cmpi slt, %24, %25 : vector<8x128xi32>
    %cst_10 = arith.constant -1.000000e+30 : f32
    %27 = vector.broadcast %cst_10 : f32 to vector<8x128xf32>
    %28 = arith.select %26, %23, %27 : vector<8x128xi1>, vector<8x128xf32>
    %cst_11 = arith.constant dense<0xFF800000> : vector<8xf32>
    %29 = vector.multi_reduction <maximumf>, %28, %cst_11 [1] : vector<8x128xf32> to vector<8xf32>
    %30 = vector.shape_cast %29 : vector<8xf32> to vector<8x1xf32>
    %31 = vector.broadcast %30 : vector<8x1xf32> to vector<8x128xf32>
    %32 = arith.subf %28, %31 : vector<8x128xf32>
    %33 = math.exp %32 : vector<8x128xf32>
    %cst_12 = arith.constant dense<0.000000e+00> : vector<8xf32>
    %34 = vector.multi_reduction <add>, %33, %cst_12 [1] : vector<8x128xf32> to vector<8xf32>
    %35 = vector.shape_cast %34 : vector<8xf32> to vector<8x1xf32>
    %36 = math.log %35 : vector<8x1xf32>
    %37 = arith.addf %30, %36 : vector<8x1xf32>
    %38 = vector.broadcast %30 : vector<8x1xf32> to vector<8x128xf32>
    %39 = arith.cmpf oeq, %28, %38 : vector<8x128xf32>
    %c128_i32 = arith.constant 128 : i32
    %40 = vector.broadcast %c128_i32 : i32 to vector<8x128xi32>
    %41 = arith.select %39, %24, %40 : vector<8x128xi1>, vector<8x128xi32>
    %cst_13 = arith.constant dense<2147483647> : vector<8xi32>
    %42 = vector.multi_reduction <minsi>, %41, %cst_13 [1] : vector<8x128xi32> to vector<8xi32>
    %43 = vector.shape_cast %42 : vector<8xi32> to vector<8x1xi32>
    %44 = vector.extract_strided_slice %23 {offsets = [0, 127], sizes = [8, 1], strides = [1, 1]} : vector<8x128xf32> to vector<8x1xf32>
    %45 = arith.subf %30, %37 : vector<8x1xf32>
    %c64_i32 = arith.constant 64 : i32
    %46 = vector.broadcast %c64_i32 : i32 to vector<8x128xi32>
    %47 = arith.cmpi slt, %24, %46 : vector<8x128xi32>
    %cst_14 = arith.constant 0.000000e+00 : f32
    %48 = vector.broadcast %cst_14 : f32 to vector<8x128xf32>
    %49 = arith.select %47, %20, %48 : vector<8x128xi1>, vector<8x128xf32>
    %c64_i32_15 = arith.constant 64 : i32
    %50 = vector.broadcast %c64_i32_15 : i32 to vector<8x128xi32>
    %51 = arith.cmpi eq, %24, %50 : vector<8x128xi32>
    %52 = vector.shape_cast %44 : vector<8x1xf32> to vector<8x1xf32>
    %53 = vector.broadcast %52 : vector<8x1xf32> to vector<8x128xf32>
    %54 = arith.select %51, %53, %49 : vector<8x128xi1>, vector<8x128xf32>
    %c65_i32 = arith.constant 65 : i32
    %55 = vector.broadcast %c65_i32 : i32 to vector<8x128xi32>
    %56 = arith.cmpi eq, %24, %55 : vector<8x128xi32>
    %57 = vector.shape_cast %45 : vector<8x1xf32> to vector<8x1xf32>
    %58 = vector.broadcast %57 : vector<8x1xf32> to vector<8x128xf32>
    %59 = arith.select %56, %58, %54 : vector<8x128xi1>, vector<8x128xf32>
    %c66_i32 = arith.constant 66 : i32
    %60 = vector.broadcast %c66_i32 : i32 to vector<8x128xi32>
    %61 = arith.cmpi eq, %24, %60 : vector<8x128xi32>
    %62 = arith.sitofp %43 : vector<8x1xi32> to vector<8x1xf32>
    %63 = vector.shape_cast %62 : vector<8x1xf32> to vector<8x1xf32>
    %64 = vector.broadcast %63 : vector<8x1xf32> to vector<8x128xf32>
    %65 = arith.select %61, %64, %59 : vector<8x128xi1>, vector<8x128xf32>
    %c0_16 = arith.constant 0 : index
    %c0_17 = arith.constant 0 : index
    %66 = vector.load %arg3[%c0_16, %c0_17] : memref<8x128xf32, #tpu.memory_space<vmem>>, vector<8x128xf32>
    tpu.vector_store %arg3[%c0_16, %c0_17], %65 {strides = array<i32>} : memref<8x128xf32, #tpu.memory_space<vmem>>, vector<8x128xf32>,
    return
  }
  func.func @transform_0(%arg0: i32) -> (i32, i32) {
    %c0_i32 = arith.constant 0 : i32
    %c0_i32_0 = arith.constant 0 : i32
    return %arg0, %c0_i32 : i32, i32
  }
  func.func @transform_1(%arg0: i32) -> (i32, i32, i32) {
    %c0_i32 = arith.constant 0 : i32
    %c0_i32_0 = arith.constant 0 : i32
    %c0_i32_1 = arith.constant 0 : i32
    %c0_i32_2 = arith.constant 0 : i32
    return %c0_i32, %c0_i32_0, %c0_i32_1 : i32, i32, i32
  }
  func.func @transform_2(%arg0: i32) -> (i32, i32) {
    %c0_i32 = arith.constant 0 : i32
    %c0_i32_0 = arith.constant 0 : i32
    return %arg0, %c0_i32 : i32, i32
  }
}

</mosaic_0001>

<bundles_post_ra>
// kernel: policy_act.1
= control target key start
LH: loop header
LB: loop body
LE: loop exit
PB: predicated region body
PF: predicated region fallthrough
CT: control target
= control target key end

     0   :  { %7 = vsyncpa [#allocation3], 0  ;;  %s622_s9 = smov [#allocation2]   ;;  %s692_s0 = inlined_call_operand.vmem [shape: f32[8,128], index: 0, kind: input, shape index: {}]   ;;  %s693_s1 = inlined_call_operand.hbm [shape: f32[3,136,128], index: 1, kind: input, shape index: {}]   ;;  %s694_s2 = inlined_call_operand.vmem [shape: f32[8,128], index: 2, kind: output, shape index: {}]  }
   0x1   :  { %s15_s10 = sshll.u32 %s622_s9, 4  ;;  %s598_s13 = scalar_lea.hbm %s693_s1, 6528  ;;  %s16_s10 = int_to_ptr.vmem [resolvable:$true] %s15_s10 }
   0x2   :  { %p599_p0 = scmp.ne.s32.totalorder %s693_s1, %s598_s13  ;;  %p602_p1 = scmp.lt.u32.totalorder %s598_s13, %s693_s1 }
   0x4   :  { %p604_p2 = pnand %p602_p1, %p599_p0 }
   0x6   :  { %607 = shalt.err (!%p604_p2)
}
   0x7   :  { %s608_s18 = scalar_lea.vmem %s16_s10, 6528  ;;  %p613_p4 = scmp.lt.s32.totalorder %s16_s10, %s16_s10 }
   0x8   :  { %p609_p3 = scmp.ne.s32.totalorder %s16_s10, %s608_s18  ;;  %p614_p5 = scmp.lt.s32.totalorder %s608_s18, %s608_s18 }
   0xa   :  { %p615_p6 = por %p614_p5, %p613_p4 }
   0xc   :  { %p616_p7 = pnand %p615_p6, %p609_p3 }
   0xe   :  { %619 = shalt.err (!%p616_p7)
}
   0xf   :  { %s623_s19 = smov 128   ;;  %s624_s20 = smov 8  }
  0x10   :  { %21 = dma.hbm_to_vmem [thread:$0]  %s693_s1, 6528, %s16_s10, [#allocation3], %s623_s19, %s623_s19, %s624_s20  }
  0x11   :  { %620 = dma.done.wait [#allocation3], 6528  }
  0x12   :  { %621 = vsyncadd [#allocation3], 4294960768  ;;  %v625_v0 = vmov 0.0|0.0   ;;  %vm626_vm0 = vmmov 0   ;;  %v627_v1 = vmov 0.0   ;;  %v26_v2 = vld [vmem:[#allocation2] sm:$0xff] }
  0x13   :  { %510 = vmatprep.subr.bf16.mxu0 %v625_v0  ;;  %437 = vmatprep.mubr.msk.f32.mxu0 %vm626_vm0, %v627_v1  ;;  %v27_v3 = vld [vmem:[#allocation2 + $0x8] sm:$0xff]  ;;  %v28_v4 = vld [vmem:[#allocation2 + $0x10] sm:$0xff]  ;;  %v29_v6 = vld [vmem:[#allocation2 + $0x18] sm:$0xff] }
  0x14   :  { %534 = vmatprep.subr.bf16.mxu1 %v625_v0  ;;  %472 = vmatprep.mubr.msk.f32.mxu1 %vm626_vm0, %v627_v1  ;;  %v511_v5 = vpack.c.bf16 %v27_v3, %v26_v2  ;;  %v514_v7 = vpack.c.bf16 %v29_v6, %v28_v4  ;;  %v30_v8 = vld [vmem:[#allocation2 + $0x20] sm:$0xff]  ;;  %v31_v9 = vld [vmem:[#allocation2 + $0x28] sm:$0xff]  ;;  %v45_v11 = vld [vmem:[#allocation2 + $0x90] sm:$0xff]  ;;  %v79_v3 = vlaneseq }
  0x15   :  { %v44_v10 = vld [vmem:[#allocation2 + $0x88] sm:$0xff]  ;;  %v46_v12 = vld [vmem:[#allocation2 + $0x98] sm:$0xff]  ;;  %v47_v13 = vld [vmem:[#allocation2 + $0xa0] sm:$0xff]  ;;  %v517_v14 = vpack.c.bf16 %v31_v9, %v30_v8 }
  0x16   :  { %512 = vmatpush3.bf16.msra.mxu0 %v511_v5  ;;  %v535_v15 = vpack.c.bf16 %v45_v11, %v44_v10  ;;  %v32_v16 = vld [vmem:[#allocation2 + $0x30] sm:$0xff]  ;;  %v33_v17 = vld [vmem:[#allocation2 + $0x38] sm:$0xff]  ;;  %v538_v18 = vpack.c.bf16 %v47_v13, %v46_v12  ;;  %v48_v19 = vld [vmem:[#allocation2 + $0xa8] sm:$0xff]  ;;  %v80_v4 = vshrl.u32 %v79_v3, 7 }
  0x17   :  { %513 = vmatprep.subr.bf16.mxu0 %v625_v0  ;;  %v49_v20 = vld [vmem:[#allocation2 + $0xb0] sm:$0xff]  ;;  %v520_v21 = vpack.c.bf16 %v33_v17, %v32_v16  ;;  %v34_v22 = vld [vmem:[#allocation2 + $0x40] sm:$0xff]  ;;  %v35_v23 = vld [vmem:[#allocation2 + $0x48] sm:$0xff] }
  0x18   :  { %536 = vmatpush3.bf16.msra.mxu1 %v535_v15  ;;  %v541_v24 = vpack.c.bf16 %v49_v20, %v48_v19  ;;  %v50_v25 = vld [vmem:[#allocation2 + $0xb8] sm:$0xff]  ;;  %v51_v26 = vld [vmem:[#allocation2 + $0xc0] sm:$0xff]  ;;  %v523_v27 = vpack.c.bf16 %v35_v23, %v34_v22  ;;  %v36_v28 = vld [vmem:[#allocation2 + $0x50] sm:$0xff]  ;;  %v81_v5 = vsub.s32 0, %v80_v4 }
  0x19   :  { %537 = vmatprep.subr.bf16.mxu1 %v625_v0  ;;  %v37_v29 = vld [vmem:[#allocation2 + $0x58] sm:$0xff]  ;;  %v544_v30 = vpack.c.bf16 %v51_v26, %v50_v25  ;;  %v52_v31 = vld [vmem:[#allocation2 + $0xc8] sm:$0xff]  ;;  %v53_v32 = vld [vmem:[#allocation2 + $0xd0] sm:$0xff] }
  0x1a   :  { %515 = vmatpush3.bf16.msra.mxu0 %v514_v7  ;;  %v526_v33 = vpack.c.bf16 %v37_v29, %v36_v28  ;;  %v38_v34 = vld [vmem:[#allocation2 + $0x60] sm:$0xff]  ;;  %v39_v35 = vld [vmem:[#allocation2 + $0x68] sm:$0xff]  ;;  %v547_v36 = vpack.c.bf16 %v53_v32, %v52_v31  ;;  %v40_v38 = vld [vmem:[#allocation2 + $0x70] sm:$0xff]  ;;  %v304_v29 = vand.u32 127, %v79_v3 }
  0x1b   :  { %516 = vmatprep.subr.bf16.mxu0 %v625_v0  ;;  %v529_v37 = vpack.c.bf16 %v39_v35, %v38_v34  ;;  %v41_v39 = vld [vmem:[#allocation2 + $0x78] sm:$0xff]  ;;  %v25_v41 = vld [vmem:[%s692_s0] sm:$0xff]  ;;  %v56_v45 = vld [vmem:[#allocation2 + $0xe8] sm:$0xff]  ;;  %v628_v34 = vmov 127  }
  0x1c   :  { %539 = vmatpush3.bf16.msra.mxu1 %v538_v18  ;;  %v532_v40 = vpack.c.bf16 %v41_v39, %v40_v38  ;;  %v54_v42 = vld [vmem:[#allocation2 + $0xd8] sm:$0xff]  ;;  %v55_v43 = vld [vmem:[#allocation2 + $0xe0] sm:$0xff]  ;;  %v57_v46 = vld [vmem:[#allocation2 + $0xf0] sm:$0xff]  ;;  %vm305_vm1 = vcmp.lt.s32.totalorder %v304_v29, 6  ;;  %589 = vset.pattern.permute.xlu0 %v628_v34  ;;  %vm334_vm4 = vcmp.lt.s32.totalorder %v304_v29, 64  ;;  %vm336_vm5 = vcmp.eq.s32.totalorder %v304_v29, 64 }
  0x1d   :  { %540 = vmatprep.subr.bf16.mxu1 %v625_v0  ;;  %v550_v44 = vpack.c.bf16 %v55_v43, %v54_v42  ;;  %v553_v47 = vpack.c.bf16 %v57_v46, %v56_v45  ;;  %v58_v48 = vld [vmem:[#allocation2 + $0xf8] sm:$0xff]  ;;  %v59_v49 = vld [vmem:[#allocation2 + $0x100] sm:$0xff]  ;;  %v62_v51 = vld [vmem:[#allocation2 + $0x110] sm:$0xff]  ;;  %vm343_vm6 = vcmp.eq.s32.totalorder %v304_v29, 65  ;;  %vm345_vm7 = vcmp.eq.s32.totalorder %v304_v29, 66 }
  0x1e   :  { %518 = vmatpush3.bf16.msra.mxu0 %v517_v14  ;;  %v556_v50 = vpack.c.bf16 %v59_v49, %v58_v48  ;;  %v63_v52 = vld [vmem:[#allocation2 + $0x118] sm:$0xff]  ;;  %v64_v53 = vld [vmem:[#allocation2 + $0x120] sm:$0xff]  ;;  %v65_v55 = vld [vmem:[#allocation2 + $0x128] sm:$0xff] }
  0x1f   :  { %519 = vmatprep.subr.bf16.mxu0 %v625_v0  ;;  %v559_v54 = vpack.c.bf16 %v63_v52, %v62_v51  ;;  %v562_v56 = vpack.c.bf16 %v65_v55, %v64_v53  ;;  %v66_v57 = vld [vmem:[#allocation2 + $0x130] sm:$0xff]  ;;  %v67_v58 = vld [vmem:[#allocation2 + $0x138] sm:$0xff]  ;;  %v68_v60 = vld [vmem:[#allocation2 + $0x140] sm:$0xff] }
  0x20   :  { %542 = vmatpush3.bf16.msra.mxu1 %v541_v24  ;;  %v565_v59 = vpack.c.bf16 %v67_v58, %v66_v57  ;;  %v69_v61 = vld [vmem:[#allocation2 + $0x148] sm:$0xff]  ;;  %v70_v63 = vld [vmem:[#allocation2 + $0x150] sm:$0xff]  ;;  %v42_v6 = vld [vmem:[#allocation2 + $0x80] sm:$0xff] }
  0x21   :  { %543 = vmatprep.subr.bf16.mxu1 %v625_v0  ;;  %v568_v62 = vpack.c.bf16 %v69_v61, %v68_v60  ;;  %v82_v7 = vrot.slane %v42_v6, %v81_v5  ;;  %v72_v12 = vld [vmem:[#allocation2 + $0x160] sm:$0xff]  ;;  %v73_v13 = vld [vmem:[#allocation2 + $0x168] sm:$0xff]  ;;  %v74_v15 = vld [vmem:[#allocation2 + $0x170] sm:$0xff] }
  0x22   :  { %521 = vmatpush3.bf16.msra.mxu0 %v520_v21  ;;  %v574_v14 = vpack.c.bf16 %v73_v13, %v72_v12  ;;  %v75_v16 = vld [vmem:[#allocation2 + $0x178] sm:$0xff]  ;;  %v76_v18 = vld [vmem:[#allocation2 + $0x180] sm:$0xff]  ;;  %v77_v19 = vld [vmem:[#allocation2 + $0x188] sm:$0xff] }
  0x23   :  { %522 = vmatprep.subr.bf16.mxu0 %v625_v0  ;;  %v577_v17 = vpack.c.bf16 %v75_v16, %v74_v15  ;;  %v580_v20 = vpack.c.bf16 %v77_v19, %v76_v18  ;;  %v60_v21 = vld [vmem:[#allocation2 + $0x108] sm:$0xff] }
  0x24   :  { %545 = vmatpush3.bf16.msra.mxu1 %v544_v30  ;;  %v157_v22 = vrot.slane %v60_v21, %v81_v5 }
  0x25   :  { %546 = vmatprep.subr.bf16.mxu1 %v625_v0 }
  0x26   :  { %524 = vmatpush3.bf16.msra.mxu0 %v523_v27  ;;  %v78_v27 = vld [vmem:[#allocation2 + $0x190] sm:$0xff] }
  0x27   :  { %525 = vmatprep.subr.bf16.mxu0 %v625_v0  ;;  %v232_v28 = vrot.slane %v78_v27, %v81_v5 }
  0x28   :  { %548 = vmatpush3.bf16.msra.mxu1 %v547_v36 }
  0x29   :  { %549 = vmatprep.subr.bf16.mxu1 %v625_v0 }
  0x2a   :  { %527 = vmatpush3.bf16.msra.mxu0 %v526_v33 }
  0x2b   :  { %528 = vmatprep.subr.bf16.mxu0 %v625_v0 }
  0x2c   :  { %551 = vmatpush3.bf16.msra.mxu1 %v550_v44 }
  0x2d   :  { %552 = vmatprep.subr.bf16.mxu1 %v625_v0 }
  0x2e   :  { %530 = vmatpush3.bf16.msra.mxu0 %v529_v37 }
  0x2f   :  { %531 = vmatprep.subr.bf16.mxu0 %v625_v0 }
  0x30   :  { %554 = vmatpush3.bf16.msra.mxu1 %v553_v47 }
  0x31   :  { %555 = vmatprep.subr.bf16.mxu1 %v625_v0 }
  0x32   :  { %533 = vmatpush3.bf16.msra.mxu0 %v532_v40 }
  0x33   :  { %558 = vmatprep.subr.bf16.mxu0 %v625_v0 }
  0x34   :  { %557 = vmatpush3.bf16.msra.mxu1 %v556_v50 }
  0x35   :  { %438 = vmatmul.mubr.f32.vlgmr.msra.gmra.mrb[0].mxu0 %v25_v41 }
  0x36   :  { %507 = vmatprep.mubr.msk.f32.mxu0 %vm626_vm0, %v627_v1  ;;  %560 = vmatpush3.bf16.msra.mxu0 %v559_v54  ;;  %v71_v1 = vld [vmem:[#allocation2 + $0x158] sm:$0xff] }
  0x37   :  { %561 = vmatprep.subr.bf16.mxu0 %v625_v0  ;;  %v571_v2 = vpack.c.bf16 %v71_v1, %v70_v63 }
  0x3a   :  { %563 = vmatpush3.bf16.msra.mxu0 %v562_v56 }
  0x3b   :  { %564 = vmatprep.subr.bf16.mxu0 %v625_v0 }
  0x3e   :  { %566 = vmatpush3.bf16.msra.mxu0 %v565_v59 }
  0x3f   :  { %567 = vmatprep.subr.bf16.mxu0 %v625_v0 }
  0x42   :  { %569 = vmatpush3.bf16.msra.mxu0 %v568_v62 }
  0x43   :  { %570 = vmatprep.subr.bf16.mxu0 %v625_v0 }
  0x46   :  { %572 = vmatpush3.bf16.msra.mxu0 %v571_v2 }
  0x47   :  { %573 = vmatprep.subr.bf16.mxu0 %v625_v0 }
  0x4a   :  { %575 = vmatpush3.bf16.msra.mxu0 %v574_v14 }
  0x4b   :  { %576 = vmatprep.subr.bf16.mxu0 %v625_v0 }
  0x4e   :  { %578 = vmatpush3.bf16.msra.mxu0 %v577_v17 }
  0x4f   :  { %579 = vmatprep.subr.bf16.mxu0 %v625_v0 }
  0x52   :  { %581 = vmatpush3.bf16.msra.mxu0 %v580_v20 }
 0x108   :  { %v149_v8 = vpop.f32.mrb[0].mxu0 }
 0x109   :  { %v150_v9 = vadd.f32 %v149_v8, %v82_v7  ;;  %v439_v10 = vpop.f32.mrb[1].mxu0 }
 0x10b   :  { %590 = vtanh.f32 %v150_v9 }
 0x115   :  { %v591_v11 = vpop.eup %590 }
 0x116   :  { %473 = vmatmul.mubr.f32.vlgmr.msra.gmra.mrb[0].mxu1 %v591_v11 }
 0x1e9   :  { %v224_v23 = vpop.f32.mrb[0].mxu1 }
 0x1ea   :  { %v225_v24 = vadd.f32 %v224_v23, %v157_v22  ;;  %v474_v25 = vpop.f32.mrb[1].mxu1 }
 0x1ec   :  { %592 = vtanh.f32 %v225_v24 }
 0x1f6   :  { %v593_v26 = vpop.eup %592 }
 0x1f7   :  { %508 = vmatmul.mubr.f32.vlgmr.msra.gmra.mrb[2].mxu0 %v593_v26  ;;  %v335_v56 = vsel %vm334_vm4, %v593_v26, 0.0 }
 0x2ca   :  { %v299_v30 = vpop.f32.mrb[2].mxu0 }
 0x2cb   :  { %v300_v31 = vadd.f32 %v299_v30, %v232_v28  ;;  %v509_v32 = vpop.f32.mrb[3].mxu0 }
 0x2cd   :  { %v306_v33 = vsel %vm305_vm1, %v300_v31, -1e+30 }
 0x2ce   :  { %307 = vmax.xlane.f32.xlu0 %v306_v33 }
 0x35b   :  { %v308_v0 = vpop.xlane.xlu0 %307 }
 0x35c   :  { %vm317_vm2 = vcmp.eq.f32.partialorder %v306_v33, %v308_v0  ;;  %v309_v35 = vsub.f32 %v306_v33, %v308_v0 }
 0x35d   :  { %v318_v36 = vsel %vm317_vm2, %v304_v29, 128 }
 0x35e   :  { %v320_v37 = vshra.s32 %v318_v36, 16  ;;  %v310_v38 = vmul.f32 1.442695, %v309_v35  ;;  %v319_v41 = vand.u32 65535, %v318_v36 }
 0x360   :  { %v322_v39 = vcvt.s32.f32 %v320_v37  ;;  %594 = vpow2.f32 %v310_v38  ;;  %v321_v43 = vcvt.s32.f32 %v319_v41 }
 0x362   :  { %323 = vmin.xlane.f32.xlu0 %v322_v39 }
 0x36a   :  { %v595_v40 = vpop.eup %594 }
 0x36b   :  { %312 = vadd.xlane.f32.xlu1 %v595_v40 }
 0x378   :  { %339 = vperm.xlu0 %589, %v300_v31  }
 0x3ef   :  { %v324_v42 = vpop.xlane.xlu0 %323 }
 0x3f0   :  { %vm325_vm3 = vcmp.eq.f32.partialorder %v322_v39, %v324_v42  ;;  %v330_v48 = vcvt.f32.s32 %v324_v42 }
 0x3f1   :  { %v326_v44 = vsel %vm325_vm3, %v321_v43, inf }
 0x3f2   :  { %327 = vmin.xlane.f32.xlu1 %v326_v44  ;;  %v331_v51 = vshll.u32 %v330_v48, 16 }
 0x3f7   :  { %v340_v53 = vpop.permute.xlu0 %339 }
 0x3f8   :  { %v313_v45 = vpop.xlane.xlu1 %312  ;;  %v342_v57 = vsel %vm336_vm5, %v340_v53, %v335_v56 }
 0x3f9   :  { %596 = vlog2.f32 %v313_v45 }
 0x403   :  { %v597_v46 = vpop.eup %596 }
 0x404   :  { %v315_v47 = vmul.f32 0.6931472, %v597_v46 }
 0x406   :  { %v316_v49 = vadd.f32 %v315_v47, %v308_v0 }
 0x408   :  { %v333_v54 = vsub.f32 %v308_v0, %v316_v49 }
 0x40a   :  { %v344_v59 = vsel %vm343_vm6, %v333_v54, %v342_v57 }
 0x47f   :  { %v328_v50 = vpop.xlane.xlu1 %327 }
 0x480   :  { %v329_v52 = vcvt.f32.s32 %v328_v50 }
 0x482   :  { %v332_v55 = vadd.s32 %v331_v51, %v329_v52 }
 0x484   :  { %v346_v58 = vcvt.s32.f32 %v332_v55 }
 0x486   :  { %v347_v60 = vsel %vm345_vm7, %v346_v58, %v344_v59 }
 0x487   :  { %348 = vst [vmem:[%s694_s2] sm:$0xff] %v347_v60 }
 0x488   :  { %353 = vsyncpa [#allocation3], 1 }

</bundles_post_ra>
